<compile_context>
chip_gen: v6e
topology: v6e:2x2x1
jax: 0.10.0
libtpu: 0.0.40
codegen_flags: <defaults>
</compile_context>

<pallas_src>
import functools

import jax
import jax.numpy as jnp
from jax.experimental import pallas as pl
from jax.experimental.pallas import tpu as pltpu


# ----------------------------------------------------------------------------
# Kernels
# ----------------------------------------------------------------------------
def _dense(x, w_ref, b_ref):
    """f32-accumulated dense layer; operands cast to the packed-weight dtype so
    bf16 packing halves weight/activation VMEM while bias/ReLU stay f32."""
    y = jnp.dot(x.astype(w_ref.dtype), w_ref[...],
                preferred_element_type=jnp.float32)
    return y + b_ref[...].astype(jnp.float32)


def dueling_q_kernel_small(s_ref, w1_ref, b1_ref, w2_ref, b2_ref,
                           w3_ref, b3_ref, o_ref, *, action_size, inv_n):
    """Grid-less kernel: whole problem lives in VMEM, combine done in-kernel."""
    h = jnp.maximum(_dense(s_ref[...], w1_ref, b1_ref), 0.0)
    h = jnp.maximum(_dense(h, w2_ref, b2_ref), 0.0)
    x3 = _dense(h, w3_ref, b3_ref)               # (B, 2A) = [x1 | x2]
    x1 = x3[:, :action_size]                     # advantage
    x2 = x3[:, action_size:]                     # value
    adv_mean = jnp.sum(x1) * inv_n               # global scalar mean of x1
    o_ref[...] = (x1 - adv_mean + x2).astype(o_ref.dtype)


def dueling_q_kernel_tiled(s_ref, w1_ref, b1_ref, w2_ref, b2_ref,
                           w3_ref, b3_ref, y_ref, psum_ref,
                           *, action_size, batch, tile):
    """Batch-tiled kernel.

    Emits y_tile = x1 + x2 and a per-tile partial sum of x1.  torch's
    x1.mean() is a GLOBAL scalar that couples every batch tile, so the wrapper
    finishes with a single y - sum(partials) * (1/(B*A)) broadcast-subtract.
    """
    h = jnp.maximum(_dense(s_ref[...], w1_ref, b1_ref), 0.0)
    h = jnp.maximum(_dense(h, w2_ref, b2_ref), 0.0)
    x3 = _dense(h, w3_ref, b3_ref)               # (TB, 2A) = [x1 | x2]
    x1 = x3[:, :action_size]
    x2 = x3[:, action_size:]
    # OOB rows of the ragged last tile are dropped by the masked store-back.
    y_ref[...] = (x1 + x2).astype(y_ref.dtype)
    # Those same OOB rows hold garbage (OOB reads of state); mask them out of
    # the global advantage sum.
    row = pl.program_id(0) * tile + jax.lax.broadcasted_iota(
        jnp.int32, x1.shape, 0)
    x1_valid = jnp.where(row < batch, x1, 0.0)
    # Broadcast the per-tile scalar across the full (1, 1, 128) lane block so
    # the wrapper's reduce is a plain full-array sum (it divides by 128).
    psum_ref[...] = jnp.zeros_like(psum_ref) + jnp.sum(x1_valid)


# ----------------------------------------------------------------------------
# Host-side wrappers
# ----------------------------------------------------------------------------
def _round_up(x, m):
    return ((x + m - 1) // m) * m


def _dual_tensorcore_chip():
    """True on chips with two TensorCores per chip (v7x)."""
    try:
        kind = jax.devices()[0].device_kind.lower()
    except Exception:
        return False
    return ("v7" in kind) or ("7x" in kind)


def _cost_estimate(B, S, H, A2, weights):
    wbytes = sum(int(w.size) * w.dtype.itemsize for w in weights)
    flops = 2 * B * (S * H + H * H + H * A2)
    bytes_accessed = B * (S + A2) * 4 + wbytes
    return pl.CostEstimate(flops=flops, transcendentals=0,
                           bytes_accessed=bytes_accessed)


_VMEM_LIMIT = 32 * 1024 * 1024   # fits v5e/v6e (128 MiB) and v7x (64 MiB)


def dueling_q_forward(state, packed, *, batch_tile=2048,
                      gridless_threshold=None):
    """state: (B, state_size) f32; packed: dict from pack_params()."""
    B, S = state.shape
    H = packed["w1"].shape[1]          # fc1_adv + fc1_val (= 128 by default)
    A2 = packed["w3"].shape[1]         # 2 * action_size
    A = A2 // 2

    weights = (packed["w1"], packed["b1"], packed["w2"], packed["b2"],
               packed["w3"], packed["b3"])
    cost = _cost_estimate(B, S, H, A2, weights)

    if gridless_threshold is None:
        # Single-TC chips (v5e/v6e): one grid-less call is fastest until VMEM
        # pressure; dual-TC v7x: switch to the tiled (megacore-parallel) path
        # earlier so both TensorCores get work.
        gridless_threshold = 1024 if _dual_tensorcore_chip() else 4096

    if B <= gridless_threshold:
        # Grid-less path: whole-array VMEM blocks, combine fully in-kernel.
        kernel = functools.partial(dueling_q_kernel_small,
                                   action_size=A, inv_n=1.0 / float(B * A))
        vmem = pl.BlockSpec(memory_space=pltpu.MemorySpace.VMEM)
        return pl.pallas_call(
            kernel,
            out_shape=jax.ShapeDtypeStruct((B, A), jnp.float32),
            in_specs=[vmem] * (1 + len(weights)),
            out_specs=vmem,
            compiler_params=pltpu.CompilerParams(vmem_limit_bytes=_VMEM_LIMIT),
            cost_estimate=cost,
        )(state, *weights)

    # Tiled path: a small, (near-)even number of large tiles.  Weights stay
    # VMEM-resident across grid steps (index_map -> (0, 0)) and
    # dimension_semantics=("parallel",) lets v7x split the tiles across its
    # two TensorCores.  No padding / slicing copies: the ragged last tile is
    # handled by the masked store-back plus the in-kernel row mask.
    n_tiles = max(2, pl.cdiv(B, batch_tile))
    TB = _round_up(pl.cdiv(B, n_tiles), 8)
    n_tiles = pl.cdiv(B, TB)

    kernel = functools.partial(dueling_q_kernel_tiled,
                               action_size=A, batch=B, tile=TB)
    resident = lambda i: (0, 0)
    y, psum = pl.pallas_call(
        kernel,
        out_shape=(jax.ShapeDtypeStruct((B, A), jnp.float32),
                   jax.ShapeDtypeStruct((n_tiles, 1, 128), jnp.float32)),
        grid=(n_tiles,),
        in_specs=[
            pl.BlockSpec((TB, S), lambda i: (i, 0)),     # state tile
            pl.BlockSpec((S, H), resident),              # packed W1
            pl.BlockSpec((1, H), resident),              # packed b1
            pl.BlockSpec((H, H), resident),              # packed W2
            pl.BlockSpec((1, H), resident),              # packed b2
            pl.BlockSpec((H, A2), resident),             # packed W3
            pl.BlockSpec((1, A2), resident),             # packed b3
        ],
        out_specs=(pl.BlockSpec((TB, A), lambda i: (i, 0)),
                   pl.BlockSpec((1, 1, 128), lambda i: (i, 0, 0))),
        compiler_params=pltpu.CompilerParams(
            dimension_semantics=("parallel",),
            vmem_limit_bytes=_VMEM_LIMIT),
        cost_estimate=cost,
    )(state, *weights)

    # Each psum block carries the per-tile x1 sum replicated across 128 lanes.
    adv_mean = jnp.sum(psum) * (1.0 / (128.0 * B * A))
    return y - adv_mean


def pack_params(p, dtype=jnp.float32):
    """Fuse the two branches into three wide matrices (+ concatenated biases).

    dtype=jnp.bfloat16 is safe on v5e/v6e/v7x (the MXU is bf16-native on all
    three); at these shapes bf16 mainly halves weight/activation VMEM (letting
    batch tiles grow) rather than changing MXU throughput.  Biases stay f32 so
    the elementwise path (bias add, ReLU, combine) remains f32.
    """
    z = lambda r, c: jnp.zeros((r, c), p["w1a"].dtype)
    w1 = jnp.concatenate([p["w1a"], p["w1v"]], axis=1)
    b1 = jnp.concatenate([p["b1a"], p["b1v"]], axis=1)
    w2 = jnp.concatenate([
        jnp.concatenate([p["w2a"], z(p["w2a"].shape[0], p["w2v"].shape[1])], axis=1),
        jnp.concatenate([z(p["w2v"].shape[0], p["w2a"].shape[1]), p["w2v"]], axis=1),
    ], axis=0)
    b2 = jnp.concatenate([p["b2a"], p["b2v"]], axis=1)
    w3 = jnp.concatenate([
        jnp.concatenate([p["w3a"], z(p["w3a"].shape[0], p["w3v"].shape[1])], axis=1),
        jnp.concatenate([z(p["w3v"].shape[0], p["w3a"].shape[1]), p["w3v"]], axis=1),
    ], axis=0)
    b3 = jnp.concatenate([p["b3a"], p["b3v"]], axis=1)
    return dict(w1=w1.astype(dtype), b1=b1, w2=w2.astype(dtype), b2=b2,
                w3=w3.astype(dtype), b3=b3)


def init_params(key, state_size, action_size, fc1_adv=64, fc2_adv=64,
                fc1_val=64, fc2_val=64):
    """Deterministic init matching nn.Linear default (U(-1/sqrt(fan_in), +))."""
    def linear(k, fan_in, fan_out):
        kw, kb = jax.random.split(k)
        bound = 1.0 / jnp.sqrt(fan_in)
        w = jax.random.uniform(kw, (fan_in, fan_out), jnp.float32, -bound, bound)
        b = jax.random.uniform(kb, (1, fan_out), jnp.float32, -bound, bound)
        return w, b

    ks = jax.random.split(key, 6)
    w1a, b1a = linear(ks[0], state_size, fc1_adv)
    w2a, b2a = linear(ks[1], fc1_adv, fc2_adv)
    w3a, b3a = linear(ks[2], fc2_adv, action_size)
    w1v, b1v = linear(ks[3], state_size, fc1_val)
    w2v, b2v = linear(ks[4], fc1_val, fc2_val)
    w3v, b3v = linear(ks[5], fc2_val, action_size)
    return dict(w1a=w1a, b1a=b1a, w2a=w2a, b2a=b2a, w3a=w3a, b3a=b3a,
                w1v=w1v, b1v=b1v, w2v=w2v, b2v=b2v, w3v=w3v, b3v=b3v)


def reference_forward(state, p):
    """Pure-JAX reference (unfused) for correctness checking."""
    x1 = jax.nn.relu(state @ p["w1a"] + p["b1a"])
    x1 = jax.nn.relu(x1 @ p["w2a"] + p["b2a"])
    x1 = x1 @ p["w3a"] + p["b3a"]
    x2 = jax.nn.relu(state @ p["w1v"] + p["b1v"])
    x2 = jax.nn.relu(x2 @ p["w2v"] + p["b2v"])
    x2 = x2 @ p["w3v"] + p["b3v"]
    return x1 - jnp.mean(x1) + x2


if __name__ == "__main__":
    key = jax.random.PRNGKey(0)
    k_params, k_state, k_big = jax.random.split(key, 3)

    state_size, action_size = 16, 4
    params = init_params(k_params, state_size, action_size)
    packed_f32 = pack_params(params)
    packed_bf16 = pack_params(params, dtype=jnp.bfloat16)

    # --- small-batch, grid-less path (combine fully in-kernel), f32 + bf16 ---
    batch = 2
    state = jax.random.normal(k_state, (batch, state_size), jnp.float32)
    ref = reference_forward(state, params)

    out = jax.block_until_ready(dueling_q_forward(state, packed_f32))
    assert out.shape == (batch, action_size)
    assert jnp.allclose(out, ref, atol=1e-5, rtol=1e-5), "small-batch f32 mismatch"

    out_bf16 = jax.block_until_ready(dueling_q_forward(state, packed_bf16))
    assert jnp.allclose(out_bf16, ref, atol=5e-2, rtol=5e-2), \
        "small-batch bf16 mismatch"

    # --- batch-tiled path (forced via gridless_threshold=0): ragged last tile,
    #     in-kernel y = x1 + x2 and masked per-tile partial sums ---
    big_batch = 300                       # NOT a multiple of the tile size
    big_state = jax.random.normal(k_big, (big_batch, state_size), jnp.float32)
    out_big = jax.block_until_ready(
        dueling_q_forward(big_state, packed_f32,
                          batch_tile=128, gridless_threshold=0))
    ref_big = reference_forward(big_state, params)
    assert out_big.shape == (big_batch, action_size)
    assert jnp.allclose(out_big, ref_big, atol=1e-4, rtol=1e-4), "tiled mismatch"

    print("KERNEL_OK")
</pallas_src>

<mosaic_0001>
module attributes {stable_mosaic.version = 11 : i64} {
  func.func @dueling_q_kernel_small(%arg0: memref<2x16xf32, #tpu.memory_space<vmem>>, %arg1: memref<16x128xf32, #tpu.memory_space<vmem>>, %arg2: memref<1x128xf32, #tpu.memory_space<vmem>>, %arg3: memref<128x128xf32, #tpu.memory_space<vmem>>, %arg4: memref<1x128xf32, #tpu.memory_space<vmem>>, %arg5: memref<128x8xf32, #tpu.memory_space<vmem>>, %arg6: memref<1x8xf32, #tpu.memory_space<vmem>>, %arg7: memref<2x4xf32, #tpu.memory_space<vmem>>) attributes {dimension_semantics = [], scalar_prefetch = 0 : i64, scratch_operands = 0 : i64, tpu.core_type = #tpu.core_type<tc>} {
    %c0 = arith.constant 0 : index
    %c0_0 = arith.constant 0 : index
    %0 = vector.load %arg0[%c0, %c0_0] : memref<2x16xf32, #tpu.memory_space<vmem>>, vector<2x16xf32>
    %c0_1 = arith.constant 0 : index
    %c0_2 = arith.constant 0 : index
    %1 = vector.load %arg1[%c0_1, %c0_2] : memref<16x128xf32, #tpu.memory_space<vmem>>, vector<16x128xf32>
    %cst = arith.constant dense<0.000000e+00> : vector<2x128xf32>
    %2 = tpu.matmul %0, %1, %cst {dimension_numbers = #tpu.dot_dimension_numbers<[1], [0], [0], [1], [0, 0, 1, 1], [], []>} : vector<2x16xf32>, vector<16x128xf32>, vector<2x128xf32> -> vector<2x128xf32>
    %c0_3 = arith.constant 0 : index
    %c0_4 = arith.constant 0 : index
    %3 = vector.load %arg2[%c0_3, %c0_4] : memref<1x128xf32, #tpu.memory_space<vmem>>, vector<1x128xf32>
    %4 = vector.broadcast %3 : vector<1x128xf32> to vector<2x128xf32>
    %5 = arith.addf %2, %4 : vector<2x128xf32>
    %cst_5 = arith.constant 0.000000e+00 : f32
    %6 = vector.broadcast %cst_5 : f32 to vector<2x128xf32>
    %7 = arith.maximumf %5, %6 : vector<2x128xf32>
    %c0_6 = arith.constant 0 : index
    %c0_7 = arith.constant 0 : index
    %8 = vector.load %arg3[%c0_6, %c0_7] : memref<128x128xf32, #tpu.memory_space<vmem>>, vector<128x128xf32>
    %cst_8 = arith.constant dense<0.000000e+00> : vector<2x128xf32>
    %9 = tpu.matmul %7, %8, %cst_8 {dimension_numbers = #tpu.dot_dimension_numbers<[1], [0], [0], [1], [0, 0, 1, 1], [], []>} : vector<2x128xf32>, vector<128x128xf32>, vector<2x128xf32> -> vector<2x128xf32>
    %c0_9 = arith.constant 0 : index
    %c0_10 = arith.constant 0 : index
    %10 = vector.load %arg4[%c0_9, %c0_10] : memref<1x128xf32, #tpu.memory_space<vmem>>, vector<1x128xf32>
    %11 = vector.broadcast %10 : vector<1x128xf32> to vector<2x128xf32>
    %12 = arith.addf %9, %11 : vector<2x128xf32>
    %cst_11 = arith.constant 0.000000e+00 : f32
    %13 = vector.broadcast %cst_11 : f32 to vector<2x128xf32>
    %14 = arith.maximumf %12, %13 : vector<2x128xf32>
    %c0_12 = arith.constant 0 : index
    %c0_13 = arith.constant 0 : index
    %15 = vector.load %arg5[%c0_12, %c0_13] : memref<128x8xf32, #tpu.memory_space<vmem>>, vector<128x8xf32>
    %cst_14 = arith.constant dense<0.000000e+00> : vector<2x8xf32>
    %16 = tpu.matmul %14, %15, %cst_14 {dimension_numbers = #tpu.dot_dimension_numbers<[1], [0], [0], [1], [0, 0, 1, 1], [], []>} : vector<2x128xf32>, vector<128x8xf32>, vector<2x8xf32> -> vector<2x8xf32>
    %c0_15 = arith.constant 0 : index
    %c0_16 = arith.constant 0 : index
    %17 = vector.load %arg6[%c0_15, %c0_16] : memref<1x8xf32, #tpu.memory_space<vmem>>, vector<1x8xf32>
    %18 = vector.broadcast %17 : vector<1x8xf32> to vector<2x8xf32>
    %19 = arith.addf %16, %18 : vector<2x8xf32>
    %20 = vector.extract_strided_slice %19 {offsets = [0, 0], sizes = [2, 4], strides = [1, 1]} : vector<2x8xf32> to vector<2x4xf32>
    %21 = vector.extract_strided_slice %19 {offsets = [0, 4], sizes = [2, 4], strides = [1, 1]} : vector<2x8xf32> to vector<2x4xf32>
    %22 = vector.shape_cast %20 : vector<2x4xf32> to vector<1x2x4xf32>
    %cst_17 = arith.constant dense<0.000000e+00> : vector<1xf32>
    %23 = vector.multi_reduction <add>, %22, %cst_17 [1, 2] : vector<1x2x4xf32> to vector<1xf32>
    %24 = vector.shape_cast %23 : vector<1xf32> to vector<1x1x1xf32>
    %25 = vector.extract %24[0, 0, 0] : f32 from vector<1x1x1xf32>
    %cst_18 = arith.constant 1.250000e-01 : f32
    %26 = arith.mulf %25, %cst_18 : f32
    %27 = vector.broadcast %26 : f32 to vector<2x4xf32>
    %28 = arith.subf %20, %27 : vector<2x4xf32>
    %29 = arith.addf %28, %21 : vector<2x4xf32>
    %c0_19 = arith.constant 0 : index
    %c0_20 = arith.constant 0 : index
    %30 = vector.load %arg7[%c0_19, %c0_20] : memref<2x4xf32, #tpu.memory_space<vmem>>, vector<2x4xf32>
    tpu.vector_store %arg7[%c0_19, %c0_20], %29 {strides = array<i32>} : memref<2x4xf32, #tpu.memory_space<vmem>>, vector<2x4xf32>,
    return
  }
}

</mosaic_0001>

<bundles_post_ra>
// kernel: tpu_custom_call.1
= control target key start
LH: loop header
LB: loop body
LE: loop exit
PB: predicated region body
PF: predicated region fallthrough
CT: control target
= control target key end

     0   :  { %12 = vsyncpa [#allocation3], 0  ;;  %s722_s0 = inlined_call_operand.vmem [shape: f32[2,16], index: 0, kind: input, shape index: {}]   ;;  %s723_s1 = inlined_call_operand.hbm [shape: f32[16,128], index: 1, kind: input, shape index: {}]   ;;  %s724_s2 = inlined_call_operand.vmem [shape: f32[1,128], index: 2, kind: input, shape index: {}]   ;;  %s725_s3 = inlined_call_operand.vmem [shape: f32[128,128], index: 3, kind: input, shape index: {}]   ;;  %s726_s4 = inlined_call_operand.vmem [shape: f32[1,128], index: 4, kind: input, shape index: {}]   ;;  %s727_s5 = inlined_call_operand.vmem [shape: f32[128,8], index: 5, kind: input, shape index: {}]   ;;  %s728_s6 = inlined_call_operand.vmem [shape: f32[1,8], index: 6, kind: input, shape index: {}]   ;;  %s729_s7 = inlined_call_operand.hbm [shape: f32[2,4], index: 7, kind: output, shape index: {}]  }
   0x1   :  { %13 = vsyncpa [#allocation4], 0  ;;  %s519_s24 = smov [#allocation2]  }
   0x2   :  { %s21_s25 = sshll.u32 %s519_s24, 4  ;;  %s22_s25 = int_to_ptr.vmem [resolvable:$true] %s21_s25 }
   0x3   :  { %s483_s26 = scalar_lea.vmem %s22_s25, 256  ;;  %p488_p1 = scmp.lt.s32.totalorder %s22_s25, %s22_s25 }
   0x4   :  { %p484_p0 = scmp.ne.s32.totalorder %s22_s25, %s483_s26  ;;  %p489_p2 = scmp.lt.s32.totalorder %s483_s26, %s483_s26 }
   0x6   :  { %p490_p3 = por %p489_p2, %p488_p1 }
   0x8   :  { %p491_p4 = pnand %p490_p3, %p484_p0 }
   0xa   :  { %494 = shalt.err (!%p491_p4)
}
   0xb   :  { %s520_s27 = smov 128   ;;  %s521_s28 = smov 8  }
   0xc   :  { %27 = dma.hbm_to_vmem [thread:$0]  %s723_s1, 256, %s22_s25, [#allocation3], %s520_s27, %s520_s27, %s521_s28  }
   0xd   :  { %515 = dma.done.wait [#allocation3], 256  }
   0xe   :  { %516 = vsyncadd [#allocation3], 4294967040  ;;  %v522_v0 = vmov 0.0   ;;  %vm523_vm0 = vmmov 0   ;;  %v43_v1 = vld [vmem:[#allocation2 + $0x8] sm:$0xff]  ;;  %v42_v2 = vld [vmem:[#allocation2] sm:$0xff] }
   0xf   :  { %389 = vmatprep.subr.mxu0 %v522_v0  ;;  %393 = vmatprep.mubr.msk.f32.mxu0 %vm523_vm0, %v522_v0  ;;  %v41_v3 = vld [vmem:[%s722_s0] sm:$0x3]  ;;  %vm51_vm1 = vcmask 130048   ;;  %v141_v4 = vld [vmem:[%s725_s3 + $0x78] sm:$0xff]  ;;  %v140_v5 = vld [vmem:[%s725_s3 + $0x70] sm:$0xff]  ;;  %vm313_vm2 = vcmask 25600  }
  0x10   :  { %396 = vmatprep.subr.mxu1 %v522_v0  ;;  %428 = vmatprep.mubr.msk.f32.mxu1 %vm523_vm0, %v522_v0  ;;  %v139_v6 = vld [vmem:[%s725_s3 + $0x68] sm:$0xff]  ;;  %v138_v7 = vld [vmem:[%s725_s3 + $0x60] sm:$0xff]  ;;  %v137_v8 = vld [vmem:[%s725_s3 + $0x58] sm:$0xff] }
  0x11   :  { %390 = vmatpush3.msra.mxu0 %v43_v1  ;;  %397 = vmatpush3.msra.mxu1 %v141_v4  ;;  %v136_v9 = vld [vmem:[%s725_s3 + $0x50] sm:$0xff]  ;;  %v135_v10 = vld [vmem:[%s725_s3 + $0x48] sm:$0xff]  ;;  %v134_v11 = vld [vmem:[%s725_s3 + $0x40] sm:$0xff] }
  0x12   :  { %391 = vmatprep.subr.mxu0 %v522_v0  ;;  %398 = vmatprep.subr.mxu1 %v522_v0  ;;  %v133_v12 = vld [vmem:[%s725_s3 + $0x38] sm:$0xff]  ;;  %v132_v13 = vld [vmem:[%s725_s3 + $0x30] sm:$0xff]  ;;  %v131_v14 = vld [vmem:[%s725_s3 + $0x28] sm:$0xff] }
  0x13   :  { %392 = vmatpush3.msra.mxu0 %v42_v2  ;;  %399 = vmatpush3.msra.mxu1 %v140_v5  ;;  %v130_v15 = vld [vmem:[%s725_s3 + $0x20] sm:$0xff]  ;;  %v129_v16 = vld [vmem:[%s725_s3 + $0x18] sm:$0xff]  ;;  %v128_v17 = vld [vmem:[%s725_s3 + $0x10] sm:$0xff] }
  0x14   :  { %394 = vmatmul.mubr.msk.f32.vlgmr.msra.gmra.mxu0 %vm51_vm1, %v41_v3  ;;  %400 = vmatprep.subr.mxu1 %v522_v0  ;;  %v127_v18 = vld [vmem:[%s725_s3 + $0x8] sm:$0xff]  ;;  %v126_v19 = vld [vmem:[%s725_s3] sm:$0xff]  ;;  %v235_v20 = vld [vmem:[%s727_s5 + $0x78] sm:$0xff] }
  0x15   :  { %431 = vmatprep.subr.mxu0 %v522_v0  ;;  %401 = vmatpush3.msra.mxu1 %v139_v6  ;;  %v234_v21 = vld [vmem:[%s727_s5 + $0x70] sm:$0xff]  ;;  %v233_v22 = vld [vmem:[%s727_s5 + $0x68] sm:$0xff]  ;;  %v232_v23 = vld [vmem:[%s727_s5 + $0x60] sm:$0xff] }
  0x16   :  { %463 = vmatprep.mubr.msk.f32.mxu0 %vm523_vm0, %v522_v0  ;;  %402 = vmatprep.subr.mxu1 %v522_v0  ;;  %v231_v24 = vld [vmem:[%s727_s5 + $0x58] sm:$0xff]  ;;  %v230_v25 = vld [vmem:[%s727_s5 + $0x50] sm:$0xff]  ;;  %v229_v26 = vld [vmem:[%s727_s5 + $0x48] sm:$0xff] }
  0x17   :  { %403 = vmatpush3.msra.mxu1 %v138_v7  ;;  %432 = vmatpush3.msra.mxu0 %v235_v20  ;;  %v228_v27 = vld [vmem:[%s727_s5 + $0x40] sm:$0xff]  ;;  %v227_v28 = vld [vmem:[%s727_s5 + $0x38] sm:$0xff]  ;;  %v226_v29 = vld [vmem:[%s727_s5 + $0x30] sm:$0xff] }
  0x18   :  { %404 = vmatprep.subr.mxu1 %v522_v0  ;;  %433 = vmatprep.subr.mxu0 %v522_v0  ;;  %v225_v30 = vld [vmem:[%s727_s5 + $0x28] sm:$0xff]  ;;  %v224_v31 = vld [vmem:[%s727_s5 + $0x20] sm:$0xff]  ;;  %v223_v32 = vld [vmem:[%s727_s5 + $0x18] sm:$0xff] }
  0x19   :  { %405 = vmatpush3.msra.mxu1 %v137_v8  ;;  %434 = vmatpush3.msra.mxu0 %v234_v21  ;;  %v348_v33 = vld [vmem:[%s724_s2] ss:$0 sm:$0xff]  ;;  %v222_v38 = vld [vmem:[%s727_s5 + $0x10] sm:$0xff]  ;;  %v221_v39 = vld [vmem:[%s727_s5 + $0x8] sm:$0xff] }
  0x1a   :  { %406 = vmatprep.subr.mxu1 %v522_v0  ;;  %435 = vmatprep.subr.mxu0 %v522_v0  ;;  %v220_v40 = vld [vmem:[%s727_s5] sm:$0xff]  ;;  %s524_s5 = smov 124  }
  0x1b   :  { %407 = vmatpush3.msra.mxu1 %v136_v9  ;;  %436 = vmatpush3.msra.mxu0 %v233_v22  ;;  %v350_v41 = vld [vmem:[%s726_s4] ss:$0 sm:$0xff] }
  0x1c   :  { %408 = vmatprep.subr.mxu1 %v522_v0  ;;  %437 = vmatprep.subr.mxu0 %v522_v0  ;;  %v351_v46 = vld [vmem:[%s728_s6] ss:$0 sm:$0xff]  ;;  %s525_s6 = smov [#allocation5]  }
  0x1d   :  { %409 = vmatpush3.msra.mxu1 %v135_v10  ;;  %438 = vmatpush3.msra.mxu0 %v232_v23  ;;  %s339_s26 = sshll.u32 %s525_s6, 4  ;;  %s340_s26 = int_to_ptr.vmem [resolvable:$true] %s339_s26 }
  0x1e   :  { %410 = vmatprep.subr.mxu1 %v522_v0  ;;  %439 = vmatprep.subr.mxu0 %v522_v0  ;;  %s495_s27 = scalar_lea.vmem %s340_s26, 32  ;;  %p500_p6 = scmp.lt.s32.totalorder %s340_s26, %s340_s26 }
  0x1f   :  { %411 = vmatpush3.msra.mxu1 %v134_v11  ;;  %440 = vmatpush3.msra.mxu0 %v231_v24  ;;  %p496_p5 = scmp.ne.s32.totalorder %s340_s26, %s495_s27  ;;  %p501_p7 = scmp.lt.s32.totalorder %s495_s27, %s495_s27 }
  0x20   :  { %412 = vmatprep.subr.mxu1 %v522_v0  ;;  %441 = vmatprep.subr.mxu0 %v522_v0 }
  0x21   :  { %413 = vmatpush3.msra.mxu1 %v133_v12  ;;  %442 = vmatpush3.msra.mxu0 %v230_v25  ;;  %p502_p8 = por %p501_p7, %p500_p6 }
  0x22   :  { %414 = vmatprep.subr.mxu1 %v522_v0  ;;  %443 = vmatprep.subr.mxu0 %v522_v0 }
  0x23   :  { %415 = vmatpush3.msra.mxu1 %v132_v13  ;;  %444 = vmatpush3.msra.mxu0 %v229_v26  ;;  %p503_p9 = pnand %p502_p8, %p496_p5 }
  0x24   :  { %416 = vmatprep.subr.mxu1 %v522_v0  ;;  %445 = vmatprep.subr.mxu0 %v522_v0 }
  0x25   :  { %417 = vmatpush3.msra.mxu1 %v131_v14  ;;  %446 = vmatpush3.msra.mxu0 %v228_v27 }
  0x26   :  { %418 = vmatprep.subr.mxu1 %v522_v0  ;;  %447 = vmatprep.subr.mxu0 %v522_v0 }
  0x27   :  { %419 = vmatpush3.msra.mxu1 %v130_v15  ;;  %448 = vmatpush3.msra.mxu0 %v227_v28 }
  0x28   :  { %420 = vmatprep.subr.mxu1 %v522_v0  ;;  %449 = vmatprep.subr.mxu0 %v522_v0 }
  0x29   :  { %421 = vmatpush3.msra.mxu1 %v129_v16  ;;  %450 = vmatpush3.msra.mxu0 %v226_v29 }
  0x2a   :  { %422 = vmatprep.subr.mxu1 %v522_v0  ;;  %451 = vmatprep.subr.mxu0 %v522_v0 }
  0x2b   :  { %423 = vmatpush3.msra.mxu1 %v128_v17  ;;  %452 = vmatpush3.msra.mxu0 %v225_v30 }
  0x2c   :  { %424 = vmatprep.subr.mxu1 %v522_v0  ;;  %453 = vmatprep.subr.mxu0 %v522_v0 }
  0x2d   :  { %425 = vmatpush3.msra.mxu1 %v127_v18  ;;  %454 = vmatpush3.msra.mxu0 %v224_v31 }
  0x2e   :  { %426 = vmatprep.subr.mxu1 %v522_v0  ;;  %455 = vmatprep.subr.mxu0 %v522_v0 }
  0x2f   :  { %427 = vmatpush3.msra.mxu1 %v126_v19  ;;  %456 = vmatpush3.msra.mxu0 %v223_v32 }
  0x30   :  { %457 = vmatprep.subr.mxu0 %v522_v0 }
  0x31   :  { %458 = vmatpush3.msra.mxu0 %v222_v38 }
  0x32   :  { %459 = vmatprep.subr.mxu0 %v522_v0 }
  0x33   :  { %460 = vmatpush3.msra.mxu0 %v221_v39 }
  0x34   :  { %461 = vmatprep.subr.mxu0 %v522_v0 }
  0x35   :  { %462 = vmatpush3.msra.mxu0 %v220_v40 }
  0xd4   :  { %v121_v34 = vpop.f32.mrf.mxu0 }
  0xd5   :  { %v122_v35 = vadd.f32 %v348_v33, %v121_v34 }
  0xd6   :  { %v395_v36 = vpop.f32.mrf.mxu0 }
  0xd7   :  { %v125_v37 = vmax.f32 %v122_v35, 0.0 }
  0xd9   :  { %429 = vmatmul.mubr.f32.vlgmr.msra.gmra.mxu1 %v125_v37 }
 0x199   :  { %v215_v42 = vpop.f32.mrf.mxu1 }
 0x19a   :  { %v216_v43 = vadd.f32 %v350_v41, %v215_v42 }
 0x19b   :  { %v430_v44 = vpop.f32.mrf.mxu1 }
 0x19c   :  { %v219_v45 = vmax.f32 %v216_v43, 0.0 }
 0x19e   :  { %464 = vmatmul.mubr.f32.vlgmr.msra.gmra.mxu0 %v219_v45 }
 0x25e   :  { %v309_v47 = vpop.f32.mrf.mxu0 }
 0x25f   :  { %v310_v48 = vadd.f32 %v351_v46, %v309_v47 }
 0x260   :  { %v465_v49 = vpop.f32.mrf.mxu0 }
 0x261   :  { %v314_v50 = vsel %vm313_vm2, %v310_v48, 0.0 }
 0x262   :  { %315 = vadd.xlane.f32.xlu0 %v314_v50 }
 0x278   :  { %328 = vrot.lane.b32.xlu0 %v310_v48, %s524_s5 }
 0x2eb   :  { %v316_v51 = vpop.xlane.xlu0 %315 }
 0x2ec   :  { %v317_v52 = vrot.slane %v316_v51, 4 }
 0x2ee   :  { %v318_v53 = vadd.f32 %v317_v52, %v316_v51 }
 0x2ef   :  { %v329_v60 = vpop.permute.xlu0 %328 }
 0x2f0   :  { %v319_v54 = vrot.slane %v318_v53, 2 }
 0x2f2   :  { %v320_v55 = vadd.f32 %v319_v54, %v318_v53 }
 0x2f4   :  { %v321_v56 = vrot.slane %v320_v55, 1 }
 0x2f6   :  { %v322_v57 = vadd.f32 %v321_v56, %v320_v55 }
 0x2f8   :  { %466 = vpush %v322_v57 }
 0x329   :  { %s467_s4 = spop %466 }
 0x32a   :  { %s324_s25 = smul.f32 0.125, %s467_s4 }
 0x32c   :  { %v325_v58 = vstv %s324_s25 }
 0x32d   :  { %v326_v59 = vsub.f32 %v310_v48, %v325_v58 }
 0x32f   :  { %v331_v61 = vadd.f32 %v329_v60, %v326_v59 }
 0x331   :  { %332 = vst.msk [vmem:[#allocation5] sm:$0x3] %vm313_vm2, %v331_v61 }
 0x332   :  { %506 = shalt.err (!%p503_p9)
}
 0x333   :  { %342 = dma.vmem_to_hbm [thread:$0]  %s340_s26, 32, %s729_s7, [#allocation4]  }
 0x334   :  { %517 = dma.done.wait [#allocation4], 32  }
 0x335   :  { %518 = vsyncadd [#allocation4], 4294967264 }
 0x336   :  { %346 = vsyncpa [#allocation3], 1 }
 0x337   :  { %347 = vsyncpa [#allocation4], 1 }

</bundles_post_ra>
